<compile_context>
chip_gen: v6e
topology: v6e:2x2x1
jax: 0.10.0
libtpu: 0.0.40
codegen_flags: <defaults>
</compile_context>

<pallas_src>
import functools

import jax
import jax.numpy as jnp
from jax.experimental import pallas as pl
from jax.experimental.pallas import tpu as pltpu


def _round_up(x, m):
    return ((x + m - 1) // m) * m


def _row_tile(M):
    """Row tile: big tiles for big M, grid>=2 for mid M, single step otherwise."""
    if M >= 1024:
        return 512
    if M >= 512:
        return 256
    if M >= 256:
        return 128
    return _round_up(M, 16)


def bf16_activations_supported():
    """bf16 VPU/EUP exists on v6e / v7x; keep f32 activations on v5e and older."""
    try:
        kind = jax.devices()[0].device_kind.lower()
    except Exception:
        return False
    return ("v6" in kind) or ("v7" in kind)


# ----------------------------------------------------------------------------
# Pallas kernel: mask/null mixing + 3-layer MLP (Linear/SiLU/Linear/SiLU/Linear)
# ----------------------------------------------------------------------------
def positionnet_kernel(x_ref, mask_ref, null_ref,
                       w1_ref, b1_ref, w2_ref, b2_ref, w3_ref, b3_ref,
                       out_ref):
    b1 = b1_ref[...]
    act_dtype = b1.dtype                   # bf16 on v6e/v7x, f32 on v5e

    m = mask_ref[...]                                             # (tm, 1)
    # fused [positive | fourier-xyxy] rows, mixed with the fused null row.
    x = x_ref[...] * m + (1.0 - m) * null_ref[...]                # (tm, K1)

    def silu(h):
        # exp on the EUP in the activation dtype; approx reciprocal on the EUP
        # in f32 (the approx unit is f32-only).  Both overlap with MXU pushes.
        e = jnp.exp(-h)
        s = pl.reciprocal((1.0 + e).astype(jnp.float32), approx=True)
        return h * s.astype(h.dtype)

    # Layer 1: single K=128 contraction (bf16 operands, f32 accumulation),
    # bias-add + SiLU in the activation dtype.
    h = jnp.dot(x.astype(jnp.bfloat16), w1_ref[...],
                preferred_element_type=jnp.float32).astype(act_dtype) + b1
    h = silu(h)

    # Layer 2.
    h = jnp.dot(h.astype(jnp.bfloat16), w2_ref[...],
                preferred_element_type=jnp.float32).astype(act_dtype) + b2_ref[...]
    h = silu(h)

    # Layer 3 (output lane-padded to a multiple of 128 for dense stores).
    out = jnp.dot(h.astype(jnp.bfloat16), w3_ref[...],
                  preferred_element_type=jnp.float32) + b3_ref[...]
    out_ref[...] = out.astype(out_ref.dtype)


# ----------------------------------------------------------------------------
# Fourier embedder (GLIGEN demo FourierEmbedder: temperature=100, ordering is
# [sin(f0*x), cos(f0*x), sin(f1*x), cos(f1*x), ...] concatenated on the last
# dim, matching the checkpoint's W1 column layout) -- tiny elementwise glue.
# ----------------------------------------------------------------------------
def fourier_embed(boxes, num_freqs=8, temperature=100.0):
    freq_bands = temperature ** (jnp.arange(num_freqs, dtype=jnp.float32)
                                 / num_freqs)
    parts = []
    for i in range(num_freqs):
        f = freq_bands[i]
        parts.append(jnp.sin(f * boxes))
        parts.append(jnp.cos(f * boxes))
    return jnp.concatenate(parts, axis=-1)      # (B, N, num_freqs*2*4)


# ----------------------------------------------------------------------------
# One-time parameter preparation (hoisted out of the per-call forward).
# ----------------------------------------------------------------------------
def prepare_params(params, *, use_bf16_activations):
    act_dtype = jnp.bfloat16 if use_bf16_activations else jnp.float32
    hidden = params["w2"].shape[0]
    out_dim = params["w3"].shape[-1]
    out_pad = _round_up(out_dim, 128)

    null = jnp.concatenate([params["null_pos"], params["null_xyxy"]]
                           ).reshape(1, -1).astype(act_dtype)       # (1, K1)
    w1 = params["w1"].astype(jnp.bfloat16)                          # (K1, H)
    w2 = params["w2"].astype(jnp.bfloat16)                          # (H, H)
    b1 = params["b1"].reshape(1, hidden).astype(act_dtype)
    b2 = params["b2"].reshape(1, hidden).astype(act_dtype)
    w3 = jnp.zeros((hidden, out_pad), jnp.float32
                   ).at[:, :out_dim].set(params["w3"]).astype(jnp.bfloat16)
    b3 = jnp.zeros((1, out_pad), jnp.float32
                   ).at[:, :out_dim].set(params["b3"].reshape(1, out_dim))
    return {"null": null, "w1": w1, "b1": b1, "w2": w2, "b2": b2,
            "w3": w3, "b3": b3}


# ----------------------------------------------------------------------------
# Wrapper
# ----------------------------------------------------------------------------
@functools.partial(jax.jit, static_argnames=("out_dim", "fourier_freqs"))
def position_net_forward(boxes, masks, positive_embeddings, prepped,
                         *, out_dim, fourier_freqs=8):
    B, N, _ = boxes.shape
    P = positive_embeddings.shape[-1]
    position_dim = fourier_freqs * 2 * 4
    K1 = P + position_dim
    hidden = prepped["w2"].shape[0]
    out_pad = prepped["w3"].shape[-1]
    act_dtype = prepped["null"].dtype        # bf16 (v6e/v7x) or f32 (v5e)

    xyxy = fourier_embed(boxes, num_freqs=fourier_freqs)       # (B, N, Dpos)

    M = B * N
    # Fused (M, K1) input: [text embedding | fourier box embedding].
    x = jnp.concatenate(
        [positive_embeddings, xyxy], axis=-1).reshape(M, K1).astype(act_dtype)
    mask = masks.reshape(M, 1).astype(act_dtype)   # 0/1 exact in bf16 too

    tm = _row_tile(M)
    M_pad = _round_up(M, tm)
    if M_pad != M:
        # Padded rows run through the null path and produce non-zero values in
        # out[M:M_pad]; they are sliced off below -- keep it that way.
        x = jnp.pad(x, ((0, M_pad - M), (0, 0)))
        mask = jnp.pad(mask, ((0, M_pad - M), (0, 0)))

    def row_spec(shape):
        return pl.BlockSpec(shape, lambda i: (i, 0))

    def const_spec(shape):
        return pl.BlockSpec(shape, lambda i: (0, 0))

    grid_spec = pl.GridSpec(
        grid=(M_pad // tm,),
        in_specs=[
            row_spec((tm, K1)),              # fused input rows (act dtype)
            row_spec((tm, 1)),               # mask rows (act dtype)
            const_spec((1, K1)),             # fused null features (act dtype)
            const_spec((K1, hidden)),        # W1 (bf16)
            const_spec((1, hidden)),         # b1 (act dtype)
            const_spec((hidden, hidden)),    # W2 (bf16)
            const_spec((1, hidden)),         # b2 (act dtype)
            const_spec((hidden, out_pad)),   # W3 (bf16, lane-padded)
            const_spec((1, out_pad)),        # b3 (f32, lane-padded)
        ],
        out_specs=row_spec((tm, out_pad)),
    )

    itemsize = jnp.dtype(act_dtype).itemsize
    bytes_accessed = int(
        M_pad * K1 * itemsize                     # x
        + M_pad * 1 * itemsize                    # mask
        + K1 * itemsize                           # null
        + (K1 * hidden + hidden * hidden + hidden * out_pad) * 2   # bf16 W
        + 2 * hidden * itemsize + out_pad * 4                      # biases
        + M_pad * out_pad * 4)                    # output (f32)
    cost = pl.CostEstimate(
        flops=2 * M_pad * (K1 * hidden + hidden * hidden + hidden * out_pad),
        transcendentals=4 * M_pad * hidden,       # 2 SiLUs x (exp + recip)
        bytes_accessed=bytes_accessed)

    out = pl.pallas_call(
        positionnet_kernel,
        out_shape=jax.ShapeDtypeStruct((M_pad, out_pad), jnp.float32),
        grid_spec=grid_spec,
        compiler_params=pltpu.CompilerParams(
            dimension_semantics=("parallel",)),
        cost_estimate=cost,
    )(x, mask, prepped["null"], prepped["w1"], prepped["b1"],
      prepped["w2"], prepped["b2"], prepped["w3"], prepped["b3"])

    return out[:M, :out_dim].reshape(B, N, out_dim)


# ----------------------------------------------------------------------------
# Pure-JAX f32 reference (mirrors the PyTorch forward exactly)
# ----------------------------------------------------------------------------
def position_net_reference(boxes, masks, positive_embeddings, params,
                           fourier_freqs=8):
    m = masks[..., None].astype(jnp.float32)
    xyxy = fourier_embed(boxes, num_freqs=fourier_freqs)
    pos = positive_embeddings * m + (1.0 - m) * params["null_pos"][None, None, :]
    xyxy = xyxy * m + (1.0 - m) * params["null_xyxy"][None, None, :]
    h = jnp.concatenate([pos, xyxy], axis=-1)
    h = jax.nn.silu(h @ params["w1"] + params["b1"])
    h = jax.nn.silu(h @ params["w2"] + params["b2"])
    return h @ params["w3"] + params["b3"]


if __name__ == "__main__":
    # Small, module-consistent shapes.
    B, N = 2, 8                 # batch, number of grounding boxes
    positive_len = 64           # text-embedding dim (small synthetic)
    out_dim = 32
    fourier_freqs = 8
    position_dim = fourier_freqs * 2 * 4   # 64
    hidden = 512

    key = jax.random.PRNGKey(0)
    ks = jax.random.split(key, 11)

    boxes = jax.random.uniform(ks[0], (B, N, 4), dtype=jnp.float32)
    masks = (jax.random.uniform(ks[1], (B, N)) > 0.5).astype(jnp.float32)
    positive_embeddings = jax.random.normal(
        ks[2], (B, N, positive_len), dtype=jnp.float32)

    def init(k, shape, scale=0.05):
        return scale * jax.random.normal(k, shape, dtype=jnp.float32)

    # Deterministic synthetic parameters (shapes follow the module __init__).
    params = {
        # nn.Parameter(torch.zeros([...])) in the module; made nonzero here so
        # the null-mixing path is actually exercised.
        "null_pos":  init(ks[3], (positive_len,)),
        "null_xyxy": init(ks[4], (position_dim,)),
        # Linear(positive_len + position_dim, 512)
        "w1": init(ks[5], (positive_len + position_dim, hidden)),
        "b1": init(ks[6], (hidden,)),
        # Linear(512, 512)
        "w2": init(ks[7], (hidden, hidden)),
        "b2": init(ks[8], (hidden,)),
        # Linear(512, out_dim)
        "w3": init(ks[9], (hidden, out_dim)),
        "b3": init(ks[10], (out_dim,)),
    }

    # One-time parameter prep (outside the jitted forward).
    use_bf16 = bf16_activations_supported()
    prepped = prepare_params(params, use_bf16_activations=use_bf16)

    objs = position_net_forward(boxes, masks, positive_embeddings, prepped,
                                out_dim=out_dim, fourier_freqs=fourier_freqs)
    objs = jax.block_until_ready(objs)
    assert objs.shape == (B, N, out_dim)

    ref = position_net_reference(boxes, masks, positive_embeddings, params,
                                 fourier_freqs=fourier_freqs)
    # Kernel uses bf16 MXU operands (f32 accumulation) and, on v6e/v7x, bf16
    # bias/SiLU activations + approx reciprocal; compare against the pure-f32
    # reference with a correspondingly relaxed tolerance.
    max_err = float(jnp.max(jnp.abs(objs - ref)))
    assert max_err < 5e-2, max_err

    print("KERNEL_OK")
</pallas_src>

<mosaic_0001>
module attributes {stable_mosaic.version = 11 : i64} {
  func.func @positionnet_kernel(%arg0: i32, %arg1: memref<16x128xf32, #tpu.memory_space<vmem>>, %arg2: memref<16x1xf32, #tpu.memory_space<vmem>>, %arg3: memref<1x128xf32, #tpu.memory_space<vmem>>, %arg4: memref<128x512xbf16, #tpu.memory_space<vmem>>, %arg5: memref<1x512xf32, #tpu.memory_space<vmem>>, %arg6: memref<512x512xbf16, #tpu.memory_space<vmem>>, %arg7: memref<1x512xf32, #tpu.memory_space<vmem>>, %arg8: memref<512x128xbf16, #tpu.memory_space<vmem>>, %arg9: memref<1x128xf32, #tpu.memory_space<vmem>>, %arg10: memref<16x128xf32, #tpu.memory_space<vmem>>) attributes {dimension_semantics = [#tpu.dimension_semantics<parallel>], iteration_bounds = array<i64: 1>, scalar_prefetch = 0 : i64, scratch_operands = 0 : i64, tpu.core_type = #tpu.core_type<tc>, window_params = [{transform_indices = @transform_0, window_bounds = array<i64: 16, 128>}, {transform_indices = @transform_1, window_bounds = array<i64: 16, 1>}, {pipeline_mode = #tpu.pipeline_mode<synchronous>, transform_indices = @transform_2, window_bounds = array<i64: 1, 128>}, {pipeline_mode = #tpu.pipeline_mode<synchronous>, transform_indices = @transform_3, window_bounds = array<i64: 128, 512>}, {pipeline_mode = #tpu.pipeline_mode<synchronous>, transform_indices = @transform_4, window_bounds = array<i64: 1, 512>}, {pipeline_mode = #tpu.pipeline_mode<synchronous>, transform_indices = @transform_5, window_bounds = array<i64: 512, 512>}, {pipeline_mode = #tpu.pipeline_mode<synchronous>, transform_indices = @transform_6, window_bounds = array<i64: 1, 512>}, {pipeline_mode = #tpu.pipeline_mode<synchronous>, transform_indices = @transform_7, window_bounds = array<i64: 512, 128>}, {pipeline_mode = #tpu.pipeline_mode<synchronous>, transform_indices = @transform_8, window_bounds = array<i64: 1, 128>}, {transform_indices = @transform_9, window_bounds = array<i64: 16, 128>}]} {
    %c0 = arith.constant 0 : index
    %c0_0 = arith.constant 0 : index
    %0 = vector.load %arg5[%c0, %c0_0] : memref<1x512xf32, #tpu.memory_space<vmem>>, vector<1x512xf32>
    %c0_1 = arith.constant 0 : index
    %c0_2 = arith.constant 0 : index
    %1 = vector.load %arg2[%c0_1, %c0_2] : memref<16x1xf32, #tpu.memory_space<vmem>>, vector<16x1xf32>
    %c0_3 = arith.constant 0 : index
    %c0_4 = arith.constant 0 : index
    %2 = vector.load %arg1[%c0_3, %c0_4] : memref<16x128xf32, #tpu.memory_space<vmem>>, vector<16x128xf32>
    %3 = vector.broadcast %1 : vector<16x1xf32> to vector<16x128xf32>
    %4 = arith.mulf %2, %3 : vector<16x128xf32>
    %cst = arith.constant 1.000000e+00 : f32
    %5 = vector.broadcast %cst : f32 to vector<16x1xf32>
    %6 = arith.subf %5, %1 : vector<16x1xf32>
    %c0_5 = arith.constant 0 : index
    %c0_6 = arith.constant 0 : index
    %7 = vector.load %arg3[%c0_5, %c0_6] : memref<1x128xf32, #tpu.memory_space<vmem>>, vector<1x128xf32>
    %8 = vector.broadcast %6 : vector<16x1xf32> to vector<16x128xf32>
    %9 = vector.broadcast %7 : vector<1x128xf32> to vector<16x128xf32>
    %10 = arith.mulf %8, %9 : vector<16x128xf32>
    %11 = arith.addf %4, %10 : vector<16x128xf32>
    %12 = arith.truncf %11 : vector<16x128xf32> to vector<16x128xbf16>
    %c0_7 = arith.constant 0 : index
    %c0_8 = arith.constant 0 : index
    %13 = vector.load %arg4[%c0_7, %c0_8] : memref<128x512xbf16, #tpu.memory_space<vmem>>, vector<128x512xbf16>
    %cst_9 = arith.constant dense<0.000000e+00> : vector<16x512xf32>
    %14 = tpu.matmul %12, %13, %cst_9 {dimension_numbers = #tpu.dot_dimension_numbers<[1], [0], [0], [1], [0, 0, 1, 1], [], []>} : vector<16x128xbf16>, vector<128x512xbf16>, vector<16x512xf32> -> vector<16x512xf32>
    %15 = vector.broadcast %0 : vector<1x512xf32> to vector<16x512xf32>
    %16 = arith.addf %14, %15 : vector<16x512xf32>
    %cst_10 = arith.constant 0.000000e+00 : f32
    %17 = vector.broadcast %cst_10 : f32 to vector<16x512xf32>
    %18 = arith.subf %17, %16 : vector<16x512xf32>
    %19 = math.exp %18 : vector<16x512xf32>
    %cst_11 = arith.constant 1.000000e+00 : f32
    %20 = vector.broadcast %cst_11 : f32 to vector<16x512xf32>
    %21 = arith.addf %20, %19 : vector<16x512xf32>
    %22 = tpu.reciprocal %21 {approx = true} : vector<16x512xf32> -> vector<16x512xf32>
    %23 = arith.mulf %16, %22 : vector<16x512xf32>
    %24 = arith.truncf %23 : vector<16x512xf32> to vector<16x512xbf16>
    %c0_12 = arith.constant 0 : index
    %c0_13 = arith.constant 0 : index
    %25 = vector.load %arg6[%c0_12, %c0_13] : memref<512x512xbf16, #tpu.memory_space<vmem>>, vector<512x512xbf16>
    %cst_14 = arith.constant dense<0.000000e+00> : vector<16x512xf32>
    %26 = tpu.matmul %24, %25, %cst_14 {dimension_numbers = #tpu.dot_dimension_numbers<[1], [0], [0], [1], [0, 0, 1, 1], [], []>} : vector<16x512xbf16>, vector<512x512xbf16>, vector<16x512xf32> -> vector<16x512xf32>
    %c0_15 = arith.constant 0 : index
    %c0_16 = arith.constant 0 : index
    %27 = vector.load %arg7[%c0_15, %c0_16] : memref<1x512xf32, #tpu.memory_space<vmem>>, vector<1x512xf32>
    %28 = vector.broadcast %27 : vector<1x512xf32> to vector<16x512xf32>
    %29 = arith.addf %26, %28 : vector<16x512xf32>
    %cst_17 = arith.constant 0.000000e+00 : f32
    %30 = vector.broadcast %cst_17 : f32 to vector<16x512xf32>
    %31 = arith.subf %30, %29 : vector<16x512xf32>
    %32 = math.exp %31 : vector<16x512xf32>
    %cst_18 = arith.constant 1.000000e+00 : f32
    %33 = vector.broadcast %cst_18 : f32 to vector<16x512xf32>
    %34 = arith.addf %33, %32 : vector<16x512xf32>
    %35 = tpu.reciprocal %34 {approx = true} : vector<16x512xf32> -> vector<16x512xf32>
    %36 = arith.mulf %29, %35 : vector<16x512xf32>
    %37 = arith.truncf %36 : vector<16x512xf32> to vector<16x512xbf16>
    %c0_19 = arith.constant 0 : index
    %c0_20 = arith.constant 0 : index
    %38 = vector.load %arg8[%c0_19, %c0_20] : memref<512x128xbf16, #tpu.memory_space<vmem>>, vector<512x128xbf16>
    %cst_21 = arith.constant dense<0.000000e+00> : vector<16x128xf32>
    %39 = tpu.matmul %37, %38, %cst_21 {dimension_numbers = #tpu.dot_dimension_numbers<[1], [0], [0], [1], [0, 0, 1, 1], [], []>} : vector<16x512xbf16>, vector<512x128xbf16>, vector<16x128xf32> -> vector<16x128xf32>
    %c0_22 = arith.constant 0 : index
    %c0_23 = arith.constant 0 : index
    %40 = vector.load %arg9[%c0_22, %c0_23] : memref<1x128xf32, #tpu.memory_space<vmem>>, vector<1x128xf32>
    %41 = vector.broadcast %40 : vector<1x128xf32> to vector<16x128xf32>
    %42 = arith.addf %39, %41 : vector<16x128xf32>
    %c0_24 = arith.constant 0 : index
    %c0_25 = arith.constant 0 : index
    %43 = vector.load %arg10[%c0_24, %c0_25] : memref<16x128xf32, #tpu.memory_space<vmem>>, vector<16x128xf32>
    tpu.vector_store %arg10[%c0_24, %c0_25], %42 {strides = array<i32>} : memref<16x128xf32, #tpu.memory_space<vmem>>, vector<16x128xf32>,
    return
  }
  func.func @transform_0(%arg0: i32) -> (i32, i32) {
    %c0_i32 = arith.constant 0 : i32
    %c0_i32_0 = arith.constant 0 : i32
    return %arg0, %c0_i32 : i32, i32
  }
  func.func @transform_1(%arg0: i32) -> (i32, i32) {
    %c0_i32 = arith.constant 0 : i32
    %c0_i32_0 = arith.constant 0 : i32
    return %arg0, %c0_i32 : i32, i32
  }
  func.func @transform_2(%arg0: i32) -> (i32, i32) {
    %c0_i32 = arith.constant 0 : i32
    %c0_i32_0 = arith.constant 0 : i32
    %c0_i32_1 = arith.constant 0 : i32
    return %c0_i32, %c0_i32_0 : i32, i32
  }
  func.func @transform_3(%arg0: i32) -> (i32, i32) {
    %c0_i32 = arith.constant 0 : i32
    %c0_i32_0 = arith.constant 0 : i32
    %c0_i32_1 = arith.constant 0 : i32
    return %c0_i32, %c0_i32_0 : i32, i32
  }
  func.func @transform_4(%arg0: i32) -> (i32, i32) {
    %c0_i32 = arith.constant 0 : i32
    %c0_i32_0 = arith.constant 0 : i32
    %c0_i32_1 = arith.constant 0 : i32
    return %c0_i32, %c0_i32_0 : i32, i32
  }
  func.func @transform_5(%arg0: i32) -> (i32, i32) {
    %c0_i32 = arith.constant 0 : i32
    %c0_i32_0 = arith.constant 0 : i32
    %c0_i32_1 = arith.constant 0 : i32
    return %c0_i32, %c0_i32_0 : i32, i32
  }
  func.func @transform_6(%arg0: i32) -> (i32, i32) {
    %c0_i32 = arith.constant 0 : i32
    %c0_i32_0 = arith.constant 0 : i32
    %c0_i32_1 = arith.constant 0 : i32
    return %c0_i32, %c0_i32_0 : i32, i32
  }
  func.func @transform_7(%arg0: i32) -> (i32, i32) {
    %c0_i32 = arith.constant 0 : i32
    %c0_i32_0 = arith.constant 0 : i32
    %c0_i32_1 = arith.constant 0 : i32
    return %c0_i32, %c0_i32_0 : i32, i32
  }
  func.func @transform_8(%arg0: i32) -> (i32, i32) {
    %c0_i32 = arith.constant 0 : i32
    %c0_i32_0 = arith.constant 0 : i32
    %c0_i32_1 = arith.constant 0 : i32
    return %c0_i32, %c0_i32_0 : i32, i32
  }
  func.func @transform_9(%arg0: i32) -> (i32, i32) {
    %c0_i32 = arith.constant 0 : i32
    %c0_i32_0 = arith.constant 0 : i32
    return %arg0, %c0_i32 : i32, i32
  }
}

</mosaic_0001>

<bundles_post_ra>
// kernel: position_net_forward.1
= control target key start
LH: loop header
LB: loop body
LE: loop exit
PB: predicated region body
PF: predicated region fallthrough
CT: control target
= control target key end

     0   :  { %14 = vsyncpa [#allocation3], 0  ;;  %s2407_s30 = smov [#allocation2]   ;;  %s2732_s0 = inlined_call_operand.vmem [shape: f32[16,128], index: 0, kind: input, shape index: {}]   ;;  %s2733_s1 = inlined_call_operand.vmem [shape: f32[16,1], index: 1, kind: input, shape index: {}]   ;;  %s2734_s2 = inlined_call_operand.vmem [shape: f32[1,128], index: 2, kind: input, shape index: {}]   ;;  %s2735_s3 = inlined_call_operand.vmem [shape: bf16[128,512], index: 3, kind: input, shape index: {}]   ;;  %s2736_s4 = inlined_call_operand.vmem [shape: f32[1,512], index: 4, kind: input, shape index: {}]   ;;  %s2737_s5 = inlined_call_operand.hbm [shape: bf16[512,512], index: 5, kind: input, shape index: {}]   ;;  %s2738_s6 = inlined_call_operand.vmem [shape: f32[1,512], index: 6, kind: input, shape index: {}]   ;;  %s2739_s7 = inlined_call_operand.vmem [shape: bf16[512,128], index: 7, kind: input, shape index: {}]   ;;  %s2740_s8 = inlined_call_operand.vmem [shape: f32[1,128], index: 8, kind: input, shape index: {}]   ;;  %s2741_s9 = inlined_call_operand.vmem [shape: f32[16,128], index: 9, kind: output, shape index: {}]  }
   0x1   :  { %s30_s10 = sshll.u32 %s2407_s30, 4  ;;  %s31_s10 = int_to_ptr.vmem [resolvable:$true] %s30_s10 }
   0x2   :  { %s2393_s11 = scalar_lea.vmem %s31_s10, 16384  ;;  %p2398_p1 = scmp.lt.s32.totalorder %s31_s10, %s31_s10 }
   0x3   :  { %p2394_p0 = scmp.ne.s32.totalorder %s31_s10, %s2393_s11  ;;  %p2399_p2 = scmp.lt.s32.totalorder %s2393_s11, %s2393_s11 }
   0x5   :  { %p2400_p3 = por %p2399_p2, %p2398_p1 }
   0x7   :  { %p2401_p4 = pnand %p2400_p3, %p2394_p0 }
   0x9   :  { %2404 = shalt.err (!%p2401_p4)
}
   0xa   :  { %s2408_s12 = smov 256   ;;  %s2409_s13 = smov 16  }
   0xb   :  { %36 = dma.hbm_to_vmem [thread:$0]  %s2737_s5, 16384, %s31_s10, [#allocation3], %s2408_s12, %s2408_s12, %s2409_s13  }
   0xc   :  { %2405 = dma.done.wait [#allocation3], 16384  }
   0xd   :  { %2406 = vsyncadd [#allocation3], 4294950912  ;;  %v2410_v0 = vmov 0   ;;  %v48_v1 = vld [vmem:[%s2733_s1] sm:$0xff]  ;;  %v49_v2 = vld [vmem:[%s2733_s1 + $0x8] sm:$0xff] }
   0xe   :  { %2047 = vset.pattern.permute.xlu0 %v2410_v0  ;;  %2048 = vset.pattern.permute.xlu1 %v2410_v0  ;;  %v64_v3 = vsub.f32 1.0, %v48_v1  ;;  %v2049_v4 = vld [vmem:[%s2735_s3 + $0xe4] ss:$16 sps:$4 sm:$0xff]   ;;  %v2051_v5 = vld [vmem:[%s2735_s3 + $0xec] ss:$16 sps:$4 sm:$0xff]   ;;  %v65_v7 = vsub.f32 1.0, %v49_v2 }
   0xf   :  { %333 = vmatprep.mubr.bf16.mxu0 %v2410_v0  ;;  %376 = vmatprep.mubr.bf16.mxu1 %v2410_v0  ;;  %v2053_v6 = vld [vmem:[%s2735_s3 + $0xe0] ss:$16 sps:$4 sm:$0xff]   ;;  %v2054_v8 = vld [vmem:[%s2735_s3 + $0xe8] ss:$16 sps:$4 sm:$0xff]   ;;  %v2055_v9 = vld [vmem:[%s2735_s3 + $0xc4] ss:$16 sps:$4 sm:$0xff]  }
  0x10   :  { %54 = vperm.xlu0 %2047, %v48_v1   ;;  %69 = vperm.xlu1 %2048, %v64_v3   ;;  %v2057_v10 = vld [vmem:[%s2735_s3 + $0xcc] ss:$16 sps:$4 sm:$0xff]   ;;  %v2059_v11 = vld [vmem:[%s2735_s3 + $0xc0] ss:$16 sps:$4 sm:$0xff]   ;;  %v2060_v12 = vld [vmem:[%s2735_s3 + $0xc8] ss:$16 sps:$4 sm:$0xff]  }
  0x11   :  { %301 = vmatprep.subr.bf16.mxu0 %v2049_v4  ;;  %344 = vmatprep.subr.bf16.mxu1 %v2051_v5  ;;  %v2061_v13 = vld [vmem:[%s2735_s3 + $0xa4] ss:$16 sps:$4 sm:$0xff]   ;;  %v2063_v14 = vld [vmem:[%s2735_s3 + $0xac] ss:$16 sps:$4 sm:$0xff]   ;;  %v2065_v15 = vld [vmem:[%s2735_s3 + $0xa0] ss:$16 sps:$4 sm:$0xff]  }
  0x12   :  { %302 = vmatpush1.bf16.msra.mxu0 %v2053_v6  ;;  %345 = vmatpush1.bf16.msra.mxu1 %v2054_v8  ;;  %v2066_v16 = vld [vmem:[%s2735_s3 + $0xa8] ss:$16 sps:$4 sm:$0xff]   ;;  %v2067_v17 = vld [vmem:[%s2735_s3 + $0x84] ss:$16 sps:$4 sm:$0xff]   ;;  %v2069_v18 = vld [vmem:[%s2735_s3 + $0x8c] ss:$16 sps:$4 sm:$0xff]  }
  0x13   :  { %303 = vmatprep.subr.bf16.mxu0 %v2055_v9  ;;  %346 = vmatprep.subr.bf16.mxu1 %v2057_v10  ;;  %v2071_v19 = vld [vmem:[%s2735_s3 + $0x80] ss:$16 sps:$4 sm:$0xff]   ;;  %v2072_v20 = vld [vmem:[%s2735_s3 + $0x88] ss:$16 sps:$4 sm:$0xff]   ;;  %v2073_v21 = vld [vmem:[%s2735_s3 + $0x64] ss:$16 sps:$4 sm:$0xff]  }
  0x14   :  { %59 = vperm.xlu0 %2047, %v49_v2   ;;  %74 = vperm.xlu1 %2048, %v65_v7   ;;  %v2075_v22 = vld [vmem:[%s2735_s3 + $0x6c] ss:$16 sps:$4 sm:$0xff]   ;;  %v2077_v23 = vld [vmem:[%s2735_s3 + $0x60] ss:$16 sps:$4 sm:$0xff]   ;;  %v2078_v24 = vld [vmem:[%s2735_s3 + $0x68] ss:$16 sps:$4 sm:$0xff]  }
  0x15   :  { %v2079_v25 = vld [vmem:[%s2735_s3 + $0x44] ss:$16 sps:$4 sm:$0xff]   ;;  %v2081_v26 = vld [vmem:[%s2735_s3 + $0x4c] ss:$16 sps:$4 sm:$0xff]   ;;  %v2083_v27 = vld [vmem:[%s2735_s3 + $0x40] ss:$16 sps:$4 sm:$0xff]  }
  0x16   :  { %304 = vmatpush1.bf16.msra.mxu0 %v2059_v11  ;;  %347 = vmatpush1.bf16.msra.mxu1 %v2060_v12  ;;  %v2084_v28 = vld [vmem:[%s2735_s3 + $0x48] ss:$16 sps:$4 sm:$0xff]   ;;  %v2085_v29 = vld [vmem:[%s2735_s3 + $0x24] ss:$16 sps:$4 sm:$0xff]   ;;  %v2087_v30 = vld [vmem:[%s2735_s3 + $0x2c] ss:$16 sps:$4 sm:$0xff]  }
  0x17   :  { %305 = vmatprep.subr.bf16.mxu0 %v2061_v13  ;;  %348 = vmatprep.subr.bf16.mxu1 %v2063_v14  ;;  %v2089_v31 = vld [vmem:[%s2735_s3 + $0x20] ss:$16 sps:$4 sm:$0xff]   ;;  %v2090_v32 = vld [vmem:[%s2735_s3 + $0x28] ss:$16 sps:$4 sm:$0xff]   ;;  %v2091_v33 = vld [vmem:[%s2735_s3 + $0x4] ss:$16 sps:$4 sm:$0xff]  }
  0x18   :  { %v2093_v34 = vld [vmem:[%s2735_s3 + $0xc] ss:$16 sps:$4 sm:$0xff]   ;;  %v2095_v35 = vld [vmem:[%s2735_s3] ss:$16 sps:$4 sm:$0xff]   ;;  %v2096_v36 = vld [vmem:[%s2735_s3 + $0x8] ss:$16 sps:$4 sm:$0xff]  }
  0x19   :  { %v2099_v37 = vld [vmem:[#allocation2 + $0xe4] ss:$16 sps:$4 sm:$0xff]   ;;  %v1805_v41 = vld [vmem:[%s2734_s2] ss:$0 sm:$0xff]  ;;  %v51_v43 = vld [vmem:[%s2732_s0 + $0x8] sm:$0xff] }
  0x1a   :  { %306 = vmatpush1.bf16.msra.mxu0 %v2065_v15  ;;  %349 = vmatpush1.bf16.msra.mxu1 %v2066_v16  ;;  %v2102_v38 = vld [vmem:[#allocation2 + $0x2e4] ss:$16 sps:$4 sm:$0xff]   ;;  %v2097_v52 = vld [vmem:[#allocation2 + $0xe0] ss:$16 sps:$4 sm:$0xff]  }
  0x1b   :  { %307 = vmatprep.subr.bf16.mxu0 %v2067_v17  ;;  %350 = vmatprep.subr.bf16.mxu1 %v2069_v18  ;;  %v50_v40 = vld [vmem:[%s2732_s0] sm:$0xff] }
  0x1c   :  { %v2100_v53 = vld [vmem:[#allocation2 + $0x2e0] ss:$16 sps:$4 sm:$0xff]   ;;  %v2105_v55 = vld [vmem:[#allocation2 + $0xc4] ss:$16 sps:$4 sm:$0xff]  }
  0x1d   :  { %v2108_v56 = vld [vmem:[#allocation2 + $0x2c4] ss:$16 sps:$4 sm:$0xff]   ;;  %v2103_v57 = vld [vmem:[#allocation2 + $0xc0] ss:$16 sps:$4 sm:$0xff]  }
  0x1e   :  { %308 = vmatpush1.bf16.msra.mxu0 %v2071_v19  ;;  %351 = vmatpush1.bf16.msra.mxu1 %v2072_v20  ;;  %v2106_v58 = vld [vmem:[#allocation2 + $0x2c0] ss:$16 sps:$4 sm:$0xff]   ;;  %v2111_v59 = vld [vmem:[#allocation2 + $0xa4] ss:$16 sps:$4 sm:$0xff]  }
  0x1f   :  { %309 = vmatprep.subr.bf16.mxu0 %v2073_v21  ;;  %352 = vmatprep.subr.bf16.mxu1 %v2075_v22  ;;  %v2114_v60 = vld [vmem:[#allocation2 + $0x2a4] ss:$16 sps:$4 sm:$0xff]   ;;  %v2109_v61 = vld [vmem:[#allocation2 + $0xa0] ss:$16 sps:$4 sm:$0xff]  }
  0x20   :  { %v2112_v62 = vld [vmem:[#allocation2 + $0x2a0] ss:$16 sps:$4 sm:$0xff]   ;;  %v2117_v63 = vld [vmem:[#allocation2 + $0x84] ss:$16 sps:$4 sm:$0xff]  }
  0x21   :  { %v2120_v0 = vld [vmem:[#allocation2 + $0x284] ss:$16 sps:$4 sm:$0xff]   ;;  %v2115_v1 = vld [vmem:[#allocation2 + $0x80] ss:$16 sps:$4 sm:$0xff]  }
  0x22   :  { %310 = vmatpush1.bf16.msra.mxu0 %v2077_v23  ;;  %353 = vmatpush1.bf16.msra.mxu1 %v2078_v24  ;;  %v2118_v2 = vld [vmem:[#allocation2 + $0x280] ss:$16 sps:$4 sm:$0xff]   ;;  %v2123_v3 = vld [vmem:[#allocation2 + $0x64] ss:$16 sps:$4 sm:$0xff]  }
  0x23   :  { %311 = vmatprep.subr.bf16.mxu0 %v2079_v25  ;;  %354 = vmatprep.subr.bf16.mxu1 %v2081_v26  ;;  %v2126_v4 = vld [vmem:[#allocation2 + $0x264] ss:$16 sps:$4 sm:$0xff]   ;;  %v2121_v5 = vld [vmem:[#allocation2 + $0x60] ss:$16 sps:$4 sm:$0xff]  }
  0x24   :  { %v2124_v6 = vld [vmem:[#allocation2 + $0x260] ss:$16 sps:$4 sm:$0xff]   ;;  %v2129_v7 = vld [vmem:[#allocation2 + $0x44] ss:$16 sps:$4 sm:$0xff]  }
  0x25   :  { %v2132_v8 = vld [vmem:[#allocation2 + $0x244] ss:$16 sps:$4 sm:$0xff]   ;;  %v2127_v9 = vld [vmem:[#allocation2 + $0x40] ss:$16 sps:$4 sm:$0xff]  }
  0x26   :  { %312 = vmatpush1.bf16.msra.mxu0 %v2083_v27  ;;  %355 = vmatpush1.bf16.msra.mxu1 %v2084_v28  ;;  %v2130_v10 = vld [vmem:[#allocation2 + $0x240] ss:$16 sps:$4 sm:$0xff]   ;;  %v2135_v11 = vld [vmem:[#allocation2 + $0x24] ss:$16 sps:$4 sm:$0xff]  }
  0x27   :  { %313 = vmatprep.subr.bf16.mxu0 %v2085_v29  ;;  %356 = vmatprep.subr.bf16.mxu1 %v2087_v30  ;;  %v2138_v12 = vld [vmem:[#allocation2 + $0x224] ss:$16 sps:$4 sm:$0xff]   ;;  %v2133_v13 = vld [vmem:[#allocation2 + $0x20] ss:$16 sps:$4 sm:$0xff]  }
  0x28   :  { %v2136_v14 = vld [vmem:[#allocation2 + $0x220] ss:$16 sps:$4 sm:$0xff]   ;;  %v2141_v15 = vld [vmem:[#allocation2 + $0x4] ss:$16 sps:$4 sm:$0xff]  }
  0x29   :  { %v2144_v16 = vld [vmem:[#allocation2 + $0x204] ss:$16 sps:$4 sm:$0xff]   ;;  %v2139_v17 = vld [vmem:[#allocation2] ss:$16 sps:$4 sm:$0xff]  }
  0x2a   :  { %314 = vmatpush1.bf16.msra.mxu0 %v2089_v31  ;;  %357 = vmatpush1.bf16.msra.mxu1 %v2090_v32  ;;  %v2142_v18 = vld [vmem:[#allocation2 + $0x200] ss:$16 sps:$4 sm:$0xff]   ;;  %v2147_v19 = vld [vmem:[#allocation2 + $0x1e4] ss:$16 sps:$4 sm:$0xff]  }
  0x2b   :  { %315 = vmatprep.subr.bf16.mxu0 %v2091_v33  ;;  %358 = vmatprep.subr.bf16.mxu1 %v2093_v34  ;;  %v2150_v20 = vld [vmem:[#allocation2 + $0x3e4] ss:$16 sps:$4 sm:$0xff]   ;;  %v2145_v21 = vld [vmem:[#allocation2 + $0x1e0] ss:$16 sps:$4 sm:$0xff]  }
  0x2c   :  { %v2148_v22 = vld [vmem:[#allocation2 + $0x3e0] ss:$16 sps:$4 sm:$0xff]   ;;  %v2153_v23 = vld [vmem:[#allocation2 + $0x1c4] ss:$16 sps:$4 sm:$0xff]  }
  0x2d   :  { %v2156_v24 = vld [vmem:[#allocation2 + $0x3c4] ss:$16 sps:$4 sm:$0xff]   ;;  %v2151_v25 = vld [vmem:[#allocation2 + $0x1c0] ss:$16 sps:$4 sm:$0xff]  }
  0x2e   :  { %316 = vmatpush1.bf16.msra.mxu0 %v2095_v35  ;;  %359 = vmatpush1.bf16.msra.mxu1 %v2096_v36  ;;  %v2154_v26 = vld [vmem:[#allocation2 + $0x3c0] ss:$16 sps:$4 sm:$0xff]   ;;  %v2159_v27 = vld [vmem:[#allocation2 + $0x1a4] ss:$16 sps:$4 sm:$0xff]  }
  0x2f   :  { %1229 = vmatprep.subr.bf16.mxu0 %v2099_v37  ;;  %1272 = vmatprep.subr.bf16.mxu1 %v2102_v38  ;;  %v2162_v28 = vld [vmem:[#allocation2 + $0x3a4] ss:$16 sps:$4 sm:$0xff]   ;;  %v2157_v29 = vld [vmem:[#allocation2 + $0x1a0] ss:$16 sps:$4 sm:$0xff]  }
  0x30   :  { %v2160_v30 = vld [vmem:[#allocation2 + $0x3a0] ss:$16 sps:$4 sm:$0xff]   ;;  %v2165_v31 = vld [vmem:[#allocation2 + $0x184] ss:$16 sps:$4 sm:$0xff]  }
  0x31   :  { %v2168_v32 = vld [vmem:[#allocation2 + $0x384] ss:$16 sps:$4 sm:$0xff]   ;;  %v2163_v33 = vld [vmem:[#allocation2 + $0x180] ss:$16 sps:$4 sm:$0xff]  }
  0x32   :  { %v2166_v34 = vld [vmem:[#allocation2 + $0x380] ss:$16 sps:$4 sm:$0xff]   ;;  %v2171_v35 = vld [vmem:[#allocation2 + $0x164] ss:$16 sps:$4 sm:$0xff]  }
  0x33   :  { %v2174_v36 = vld [vmem:[#allocation2 + $0x364] ss:$16 sps:$4 sm:$0xff]   ;;  %v2169_v37 = vld [vmem:[#allocation2 + $0x160] ss:$16 sps:$4 sm:$0xff]  }
  0x34   :  { %v2172_v38 = vld [vmem:[#allocation2 + $0x360] ss:$16 sps:$4 sm:$0xff]  }
  0x8b   :  { %v55_v39 = vpop.permute.xlu0 %54  ;;  %v70_v42 = vpop.permute.xlu1 %69 }
  0x8c   :  { %v62_v45 = vmul.f32 %v55_v39, %v50_v40  ;;  %v83_v46 = vmul.f32 %v1805_v41, %v70_v42  ;;  %v2177_v39 = vld [vmem:[#allocation2 + $0x144] ss:$16 sps:$4 sm:$0xff]   ;;  %v2178_v42 = vld [vmem:[#allocation2 + $0x340] ss:$16 sps:$4 sm:$0xff]  }
  0x8d   :  { %v2180_v40 = vld [vmem:[#allocation2 + $0x344] ss:$16 sps:$4 sm:$0xff]  }
  0x8e   :  { %v85_v50 = vadd.f32 %v83_v46, %v62_v45  ;;  %v2181_v45 = vld [vmem:[#allocation2 + $0x120] ss:$16 sps:$4 sm:$0xff]  }
  0x8f   :  { %v60_v44 = vpop.permute.xlu0 %59  ;;  %v75_v47 = vpop.permute.xlu1 %74  ;;  %v2184_v46 = vld [vmem:[#allocation2 + $0x320] ss:$16 sps:$4 sm:$0xff]  }
  0x90   :  { %v63_v48 = vmul.f32 %v60_v44, %v51_v43  ;;  %v84_v49 = vmul.f32 %v1805_v41, %v75_v47  ;;  %v2175_v41 = vld [vmem:[#allocation2 + $0x140] ss:$16 sps:$4 sm:$0xff]   ;;  %v2183_v43 = vld [vmem:[#allocation2 + $0x124] ss:$16 sps:$4 sm:$0xff]  }
  0x91   :  { %v2186_v44 = vld [vmem:[#allocation2 + $0x324] ss:$16 sps:$4 sm:$0xff]  }
  0x92   :  { %v86_v51 = vadd.f32 %v84_v49, %v63_v48  ;;  %v2189_v47 = vld [vmem:[#allocation2 + $0x104] ss:$16 sps:$4 sm:$0xff]   ;;  %v2187_v49 = vld [vmem:[#allocation2 + $0x100] ss:$16 sps:$4 sm:$0xff]  }
  0x93   :  { %v2192_v48 = vld [vmem:[#allocation2 + $0x304] ss:$16 sps:$4 sm:$0xff]  }
  0x94   :  { %v87_v54 = vpack.c.bf16 %v86_v51, %v85_v50  ;;  %v2190_v50 = vld [vmem:[#allocation2 + $0x300] ss:$16 sps:$4 sm:$0xff]   ;;  %v2195_v51 = vld [vmem:[#allocation2 + $0xec] ss:$16 sps:$4 sm:$0xff]  }
  0x96   :  { %334 = vmatmul.mubr.bf16.vlgmr.msra.gmra.mxu0 %v87_v54  ;;  %377 = vmatmul.mubr.bf16.vlgmr.msra.gmra.mxu1 %v87_v54 }
  0x97   :  { %1230 = vmatpush1.bf16.msra.mxu0 %v2097_v52  ;;  %1273 = vmatpush1.bf16.msra.mxu1 %v2100_v53  ;;  %v2198_v52 = vld [vmem:[#allocation2 + $0x2ec] ss:$16 sps:$4 sm:$0xff]   ;;  %v121_v53 = vlaneseq }
  0x98   :  { %1231 = vmatprep.subr.bf16.mxu0 %v2105_v55  ;;  %1274 = vmatprep.subr.bf16.mxu1 %v2108_v56 }
  0x99   :  { %v2575_v54 = vshrl.u32 %v121_v53, 7 }
  0x9b   :  { %1232 = vmatpush1.bf16.msra.mxu0 %v2103_v57  ;;  %1275 = vmatpush1.bf16.msra.mxu1 %v2106_v58  ;;  %v123_v55 = vsub.s32 0, %v2575_v54  ;;  %v131_v56 = vsub.s32 2, %v2575_v54  ;;  %v47_v57 = vld [vmem:[%s2736_s4] sm:$0xf]  ;;  %v127_v58 = vsub.s32 1, %v2575_v54 }
  0x9c   :  { %1233 = vmatprep.subr.bf16.mxu0 %v2111_v59  ;;  %1276 = vmatprep.subr.bf16.mxu1 %v2114_v60  ;;  %v135_v59 = vsub.s32 3, %v2575_v54 }
  0x9d   :  { %v124_v60 = vrot.slane %v47_v57, %v123_v55 }
  0x9f   :  { %1234 = vmatpush1.bf16.msra.mxu0 %v2109_v61  ;;  %1277 = vmatpush1.bf16.msra.mxu1 %v2112_v62  ;;  %v132_v61 = vrot.slane %v47_v57, %v131_v56  ;;  %v128_v62 = vrot.slane %v47_v57, %v127_v58 }
  0xa0   :  { %1235 = vmatprep.subr.bf16.mxu0 %v2117_v63  ;;  %1278 = vmatprep.subr.bf16.mxu1 %v2120_v0  ;;  %v136_v63 = vrot.slane %v47_v57, %v135_v59 }
  0xa3   :  { %1236 = vmatpush1.bf16.msra.mxu0 %v2115_v1  ;;  %1279 = vmatpush1.bf16.msra.mxu1 %v2118_v2 }
  0xa4   :  { %1237 = vmatprep.subr.bf16.mxu0 %v2123_v3  ;;  %1280 = vmatprep.subr.bf16.mxu1 %v2126_v4 }
  0xa7   :  { %1238 = vmatpush1.bf16.msra.mxu0 %v2121_v5  ;;  %1281 = vmatpush1.bf16.msra.mxu1 %v2124_v6 }
  0xa8   :  { %1239 = vmatprep.subr.bf16.mxu0 %v2129_v7  ;;  %1282 = vmatprep.subr.bf16.mxu1 %v2132_v8 }
  0xab   :  { %1240 = vmatpush1.bf16.msra.mxu0 %v2127_v9  ;;  %1283 = vmatpush1.bf16.msra.mxu1 %v2130_v10 }
  0xac   :  { %1241 = vmatprep.subr.bf16.mxu0 %v2135_v11  ;;  %1284 = vmatprep.subr.bf16.mxu1 %v2138_v12 }
  0xaf   :  { %1242 = vmatpush1.bf16.msra.mxu0 %v2133_v13  ;;  %1285 = vmatpush1.bf16.msra.mxu1 %v2136_v14 }
  0xb0   :  { %1243 = vmatprep.subr.bf16.mxu0 %v2141_v15  ;;  %1286 = vmatprep.subr.bf16.mxu1 %v2144_v16 }
  0xb3   :  { %1244 = vmatpush1.bf16.msra.mxu0 %v2139_v17  ;;  %1287 = vmatpush1.bf16.msra.mxu1 %v2142_v18 }
  0xb4   :  { %1245 = vmatprep.subr.bf16.mxu0 %v2147_v19  ;;  %1288 = vmatprep.subr.bf16.mxu1 %v2150_v20 }
  0xb7   :  { %1246 = vmatpush2.bf16.msra.mxu0 %v2145_v21  ;;  %1289 = vmatpush2.bf16.msra.mxu1 %v2148_v22 }
  0xb8   :  { %1247 = vmatprep.subr.bf16.mxu0 %v2153_v23  ;;  %1290 = vmatprep.subr.bf16.mxu1 %v2156_v24 }
  0xbb   :  { %1248 = vmatpush2.bf16.msra.mxu0 %v2151_v25  ;;  %1291 = vmatpush2.bf16.msra.mxu1 %v2154_v26 }
  0xbc   :  { %1249 = vmatprep.subr.bf16.mxu0 %v2159_v27  ;;  %1292 = vmatprep.subr.bf16.mxu1 %v2162_v28 }
  0xbf   :  { %1250 = vmatpush2.bf16.msra.mxu0 %v2157_v29  ;;  %1293 = vmatpush2.bf16.msra.mxu1 %v2160_v30 }
  0xc0   :  { %1251 = vmatprep.subr.bf16.mxu0 %v2165_v31  ;;  %1294 = vmatprep.subr.bf16.mxu1 %v2168_v32 }
  0xc3   :  { %1252 = vmatpush2.bf16.msra.mxu0 %v2163_v33  ;;  %1295 = vmatpush2.bf16.msra.mxu1 %v2166_v34 }
  0xc4   :  { %1253 = vmatprep.subr.bf16.mxu0 %v2171_v35  ;;  %1296 = vmatprep.subr.bf16.mxu1 %v2174_v36 }
  0xc7   :  { %1254 = vmatpush2.bf16.msra.mxu0 %v2169_v37  ;;  %1297 = vmatpush2.bf16.msra.mxu1 %v2172_v38 }
  0xc8   :  { %1255 = vmatprep.subr.bf16.mxu0 %v2177_v39  ;;  %1298 = vmatprep.subr.bf16.mxu1 %v2180_v40 }
  0xcb   :  { %1256 = vmatpush2.bf16.msra.mxu0 %v2175_v41  ;;  %1299 = vmatpush2.bf16.msra.mxu1 %v2178_v42 }
  0xcc   :  { %1257 = vmatprep.subr.bf16.mxu0 %v2183_v43  ;;  %1300 = vmatprep.subr.bf16.mxu1 %v2186_v44 }
  0xcf   :  { %1258 = vmatpush2.bf16.msra.mxu0 %v2181_v45  ;;  %1301 = vmatpush2.bf16.msra.mxu1 %v2184_v46 }
  0xd0   :  { %1259 = vmatprep.subr.bf16.mxu0 %v2189_v47  ;;  %1302 = vmatprep.subr.bf16.mxu1 %v2192_v48 }
  0xd3   :  { %1260 = vmatpush2.bf16.msra.mxu0 %v2187_v49  ;;  %1303 = vmatpush2.bf16.msra.mxu1 %v2190_v50 }
  0xd4   :  { %1315 = vmatprep.subr.bf16.mxu0 %v2195_v51  ;;  %1358 = vmatprep.subr.bf16.mxu1 %v2198_v52 }
 0x156   :  { %v335_v0 = vpop.f32.mrf.mxu0  ;;  %v378_v1 = vpop.f32.mrf.mxu1 }
 0x157   :  { %v2592_v2 = vadd.f32 %v335_v0, %v124_v60  ;;  %v2594_v3 = vadd.f32 %v378_v1, %v132_v61 }
 0x158   :  { %v337_v4 = vpop.f32.mrf.mxu0  ;;  %v380_v5 = vpop.f32.mrf.mxu1 }
 0x159   :  { %v387_v6 = vsub.f32 0.0, %v2592_v2  ;;  %v389_v7 = vsub.f32 0.0, %v2594_v3  ;;  %v2598_v8 = vadd.f32 %v337_v4, %v128_v62  ;;  %v2600_v9 = vadd.f32 %v380_v5, %v136_v63 }
 0x15a   :  { %v339_v10 = vpop.f32.mrf.mxu0  ;;  %v382_v11 = vpop.f32.mrf.mxu1 }
 0x15b   :  { %v395_v12 = vmul.f32 1.442695, %v387_v6  ;;  %v399_v13 = vmul.f32 1.442695, %v389_v7  ;;  %v388_v14 = vsub.f32 0.0, %v2598_v8  ;;  %v390_v15 = vsub.f32 0.0, %v2600_v9 }
 0x15c   :  { %v340_v16 = vadd.f32 %v339_v10, %v124_v60  ;;  %v383_v17 = vadd.f32 %v382_v11, %v132_v61  ;;  %v341_v18 = vpop.f32.mrf.mxu0  ;;  %v384_v19 = vpop.f32.mrf.mxu1  ;;  %v2193_v10 = vld [vmem:[#allocation2 + $0xe8] ss:$16 sps:$4 sm:$0xff]  }
 0x15d   :  { %2321 = vpow2.f32 %v395_v12  ;;  %v397_v20 = vmul.f32 1.442695, %v388_v14  ;;  %v401_v21 = vmul.f32 1.442695, %v390_v15  ;;  %v342_v22 = vadd.f32 %v341_v18, %v128_v62  ;;  %v2201_v15 = vld [vmem:[#allocation2 + $0xcc] ss:$16 sps:$4 sm:$0xff]  }
 0x15e   :  { %2323 = vpow2.f32 %v399_v13  ;;  %v391_v23 = vsub.f32 0.0, %v340_v16  ;;  %v393_v24 = vsub.f32 0.0, %v383_v17  ;;  %v385_v25 = vadd.f32 %v384_v19, %v136_v63  ;;  %v2196_v13 = vld [vmem:[#allocation2 + $0x2e8] ss:$16 sps:$4 sm:$0xff]   ;;  %v2213_v19 = vld [vmem:[#allocation2 + $0x8c] ss:$16 sps:$4 sm:$0xff]  }
 0x15f   :  { %2325 = vpow2.f32 %v397_v20  ;;  %v392_v26 = vsub.f32 0.0, %v342_v22  ;;  %v2208_v18 = vld [vmem:[#allocation2 + $0x2a8] ss:$16 sps:$4 sm:$0xff]   ;;  %v2216_v20 = vld [vmem:[#allocation2 + $0x28c] ss:$16 sps:$4 sm:$0xff]  }
 0x160   :  { %2327 = vpow2.f32 %v401_v21  ;;  %v403_v27 = vmul.f32 1.442695, %v391_v23  ;;  %v407_v28 = vmul.f32 1.442695, %v393_v24  ;;  %v394_v29 = vsub.f32 0.0, %v385_v25 }
 0x161   :  { %v405_v30 = vmul.f32 1.442695, %v392_v26  ;;  %v2211_v21 = vld [vmem:[#allocation2 + $0x88] ss:$16 sps:$4 sm:$0xff]   ;;  %v2219_v23 = vld [vmem:[#allocation2 + $0x6c] ss:$16 sps:$4 sm:$0xff]  }
 0x162   :  { %2329 = vpow2.f32 %v403_v27  ;;  %v409_v31 = vmul.f32 1.442695, %v394_v29  ;;  %v2222_v24 = vld [vmem:[#allocation2 + $0x26c] ss:$16 sps:$4 sm:$0xff]   ;;  %v2220_v26 = vld [vmem:[#allocation2 + $0x268] ss:$16 sps:$4 sm:$0xff]  }
 0x163   :  { %2331 = vpow2.f32 %v407_v28  ;;  %v2225_v27 = vld [vmem:[#allocation2 + $0x4c] ss:$16 sps:$4 sm:$0xff]   ;;  %v2223_v29 = vld [vmem:[#allocation2 + $0x48] ss:$16 sps:$4 sm:$0xff]  }
 0x164   :  { %2333 = vpow2.f32 %v405_v30  ;;  %v2228_v28 = vld [vmem:[#allocation2 + $0x24c] ss:$16 sps:$4 sm:$0xff]   ;;  %v2226_v30 = vld [vmem:[#allocation2 + $0x248] ss:$16 sps:$4 sm:$0xff]  }
 0x165   :  { %2335 = vpow2.f32 %v409_v31  ;;  %v2231_v31 = vld [vmem:[#allocation2 + $0x2c] ss:$16 sps:$4 sm:$0xff]  }
 0x16a   :  { %v2322_v32 = vpop.eup %2321 }
 0x16b   :  { %v2324_v33 = vpop.eup %2323  ;;  %v411_v34 = vadd.f32 1.0, %v2322_v32  ;;  %v2234_v32 = vld [vmem:[#allocation2 + $0x22c] ss:$16 sps:$4 sm:$0xff]  }
 0x16c   :  { %v2326_v35 = vpop.eup %2325  ;;  %v413_v36 = vadd.f32 1.0, %v2324_v33  ;;  %v2229_v33 = vld [vmem:[#allocation2 + $0x28] ss:$16 sps:$4 sm:$0xff]  }
 0x16d   :  { %v2328_v37 = vpop.eup %2327  ;;  %v412_v38 = vadd.f32 1.0, %v2326_v35  ;;  %2337 = vrcp.f32 %v411_v34  ;;  %v2232_v34 = vld [vmem:[#allocation2 + $0x228] ss:$16 sps:$4 sm:$0xff]   ;;  %v2237_v35 = vld [vmem:[#allocation2 + $0xc] ss:$16 sps:$4 sm:$0xff]  }
 0x16e   :  { %v414_v39 = vadd.f32 1.0, %v2328_v37  ;;  %2339 = vrcp.f32 %v413_v36  ;;  %v2240_v36 = vld [vmem:[#allocation2 + $0x20c] ss:$16 sps:$4 sm:$0xff]   ;;  %v2235_v37 = vld [vmem:[#allocation2 + $0x8] ss:$16 sps:$4 sm:$0xff]  }
 0x16f   :  { %v2330_v40 = vpop.eup %2329  ;;  %2341 = vrcp.f32 %v412_v38  ;;  %v2238_v38 = vld [vmem:[#allocation2 + $0x208] ss:$16 sps:$4 sm:$0xff]  }
 0x170   :  { %v2332_v41 = vpop.eup %2331  ;;  %v415_v42 = vadd.f32 1.0, %v2330_v40  ;;  %2343 = vrcp.f32 %v414_v39  ;;  %v2243_v39 = vld [vmem:[#allocation2 + $0x1ec] ss:$16 sps:$4 sm:$0xff]  }
 0x171   :  { %v2334_v43 = vpop.eup %2333  ;;  %v417_v44 = vadd.f32 1.0, %v2332_v41  ;;  %v2246_v40 = vld [vmem:[#allocation2 + $0x3ec] ss:$16 sps:$4 sm:$0xff]   ;;  %v2241_v41 = vld [vmem:[#allocation2 + $0x1e8] ss:$16 sps:$4 sm:$0xff]  }
 0x172   :  { %v2336_v45 = vpop.eup %2335  ;;  %2345 = vrcp.f32 %v415_v42  ;;  %v416_v46 = vadd.f32 1.0, %v2334_v43  ;;  %v2244_v42 = vld [vmem:[#allocation2 + $0x3e8] ss:$16 sps:$4 sm:$0xff]   ;;  %v2249_v43 = vld [vmem:[#allocation2 + $0x1cc] ss:$16 sps:$4 sm:$0xff]  }
 0x173   :  { %2347 = vrcp.f32 %v417_v44  ;;  %v418_v47 = vadd.f32 1.0, %v2336_v45  ;;  %v2252_v44 = vld [vmem:[#allocation2 + $0x3cc] ss:$16 sps:$4 sm:$0xff]   ;;  %v2247_v45 = vld [vmem:[#allocation2 + $0x1c8] ss:$16 sps:$4 sm:$0xff]  }
 0x174   :  { %2349 = vrcp.f32 %v416_v46  ;;  %v2250_v46 = vld [vmem:[#allocation2 + $0x3c8] ss:$16 sps:$4 sm:$0xff]  }
 0x175   :  { %2351 = vrcp.f32 %v418_v47  ;;  %v2255_v47 = vld [vmem:[#allocation2 + $0x1ac] ss:$16 sps:$4 sm:$0xff]  }
 0x17a   :  { %v2338_v48 = vpop.eup %2337 }
 0x17b   :  { %v2340_v49 = vpop.eup %2339  ;;  %v427_v1 = vmul.f32 %v2338_v48, %v2592_v2  ;;  %v2199_v2 = vld [vmem:[#allocation2 + $0xc8] ss:$16 sps:$4 sm:$0xff]   ;;  %v2258_v48 = vld [vmem:[#allocation2 + $0x3ac] ss:$16 sps:$4 sm:$0xff]  }
 0x17c   :  { %v2342_v50 = vpop.eup %2341  ;;  %v429_v6 = vmul.f32 %v2340_v49, %v2594_v3  ;;  %v2202_v3 = vld [vmem:[#allocation2 + $0x2c8] ss:$16 sps:$4 sm:$0xff]  }
 0x17d   :  { %v2344_v51 = vpop.eup %2343  ;;  %v428_v62 = vmul.f32 %v2342_v50, %v2598_v8  ;;  %v2204_v8 = vld [vmem:[#allocation2 + $0x2cc] ss:$16 sps:$4 sm:$0xff]   ;;  %v2253_v49 = vld [vmem:[#allocation2 + $0x1a8] ss:$16 sps:$4 sm:$0xff]  }
 0x17e   :  { %v430_v4 = vmul.f32 %v2344_v51, %v2600_v9  ;;  %v2207_v9 = vld [vmem:[#allocation2 + $0xac] ss:$16 sps:$4 sm:$0xff]   ;;  %v2256_v50 = vld [vmem:[#allocation2 + $0x3a8] ss:$16 sps:$4 sm:$0xff]  }
 0x17f   :  { %v2346_v52 = vpop.eup %2345  ;;  %v2261_v51 = vld [vmem:[#allocation2 + $0x18c] ss:$16 sps:$4 sm:$0xff]  }
 0x180   :  { %v2348_v53 = vpop.eup %2347  ;;  %v431_v60 = vmul.f32 %v2346_v52, %v340_v16  ;;  %v2210_v16 = vld [vmem:[#allocation2 + $0x2ac] ss:$16 sps:$4 sm:$0xff]  }
 0x181   :  { %v2350_v57 = vpop.eup %2349  ;;  %v433_v63 = vmul.f32 %v2348_v53, %v383_v17  ;;  %v2205_v17 = vld [vmem:[#allocation2 + $0xa8] ss:$16 sps:$4 sm:$0xff]   ;;  %v2264_v52 = vld [vmem:[#allocation2 + $0x38c] ss:$16 sps:$4 sm:$0xff]  }
 0x182   :  { %v2352_v61 = vpop.eup %2351  ;;  %v432_v0 = vmul.f32 %v2350_v57, %v342_v22  ;;  %v2608_v11 = vpack.c.bf16 %v431_v60, %v427_v1  ;;  %v2214_v22 = vld [vmem:[#allocation2 + $0x288] ss:$16 sps:$4 sm:$0xff]   ;;  %v2267_v60 = vld [vmem:[#allocation2 + $0x16c] ss:$16 sps:$4 sm:$0xff]  }
 0x183   :  { %v434_v5 = vmul.f32 %v2352_v61, %v385_v25  ;;  %v2610_v14 = vpack.c.bf16 %v433_v63, %v429_v6  ;;  %v2217_v25 = vld [vmem:[#allocation2 + $0x68] ss:$16 sps:$4 sm:$0xff]   ;;  %v2270_v61 = vld [vmem:[#allocation2 + $0x36c] ss:$16 sps:$4 sm:$0xff]  }
 0x184   :  { %v436_v7 = vpack.c.bf16 %v432_v0, %v428_v62  ;;  %v2259_v53 = vld [vmem:[#allocation2 + $0x188] ss:$16 sps:$4 sm:$0xff]   ;;  %v2273_v0 = vld [vmem:[#allocation2 + $0x14c] ss:$16 sps:$4 sm:$0xff]  }
 0x185   :  { %v438_v12 = vpack.c.bf16 %v434_v5, %v430_v4  ;;  %v2262_v57 = vld [vmem:[#allocation2 + $0x388] ss:$16 sps:$4 sm:$0xff]   ;;  %v2276_v1 = vld [vmem:[#allocation2 + $0x34c] ss:$16 sps:$4 sm:$0xff]  }
 0x186   :  { %1261 = vmatprep.mubr.bf16.mxu0 %v436_v7  ;;  %v2265_v62 = vld [vmem:[#allocation2 + $0x168] ss:$16 sps:$4 sm:$0xff]   ;;  %v2279_v6 = vld [vmem:[#allocation2 + $0x12c] ss:$16 sps:$4 sm:$0xff]  }
 0x187   :  { %1304 = vmatprep.mubr.bf16.mxu1 %v438_v12  ;;  %1262 = vmatmul.mubr.bf16.vlgmr.msra.gmra.mxu0 %v2608_v11  ;;  %v2268_v63 = vld [vmem:[#allocation2 + $0x368] ss:$16 sps:$4 sm:$0xff]  }
 0x188   :  { %1305 = vmatmul.mubr.bf16.vlgmr.msra.gmra.mxu1 %v2610_v14  ;;  %1316 = vmatpush1.bf16.msra.mxu0 %v2193_v10  ;;  %v2271_v4 = vld [vmem:[#allocation2 + $0x148] ss:$16 sps:$4 sm:$0xff]  }
 0x189   :  { %1359 = vmatpush1.bf16.msra.mxu1 %v2196_v13  ;;  %1347 = vmatprep.mubr.bf16.mxu0 %v436_v7  ;;  %v2274_v5 = vld [vmem:[#allocation2 + $0x348] ss:$16 sps:$4 sm:$0xff]   ;;  %v2282_v7 = vld [vmem:[#allocation2 + $0x32c] ss:$16 sps:$4 sm:$0xff]  }
 0x18a   :  { %1390 = vmatprep.mubr.bf16.mxu1 %v438_v12  ;;  %1317 = vmatprep.subr.bf16.mxu0 %v2201_v15  ;;  %v2277_v10 = vld [vmem:[#allocation2 + $0x128] ss:$16 sps:$4 sm:$0xff]   ;;  %v2285_v13 = vld [vmem:[#allocation2 + $0x10c] ss:$16 sps:$4 sm:$0xff]  }
 0x18b   :  { %1360 = vmatprep.subr.bf16.mxu1 %v2204_v8  ;;  %v2280_v12 = vld [vmem:[#allocation2 + $0x328] ss:$16 sps:$4 sm:$0xff]   ;;  %v2288_v15 = vld [vmem:[#allocation2 + $0x30c] ss:$16 sps:$4 sm:$0xff]  }
 0x18c   :  { %1318 = vmatpush1.bf16.msra.mxu0 %v2199_v2  ;;  %v2283_v8 = vld [vmem:[#allocation2 + $0x108] ss:$16 sps:$4 sm:$0xff]  }
 0x18d   :  { %1361 = vmatpush1.bf16.msra.mxu1 %v2202_v3  ;;  %1319 = vmatprep.subr.bf16.mxu0 %v2207_v9  ;;  %v2286_v2 = vld [vmem:[#allocation2 + $0x308] ss:$16 sps:$4 sm:$0xff]  }
 0x18e   :  { %1362 = vmatprep.subr.bf16.mxu1 %v2210_v16  ;;  %v2289_v3 = vld [vmem:[%s2739_s7 + $0x78] sm:$0xff]   ;;  %v2291_v16 = vld [vmem:[%s2739_s7 + $0x70] sm:$0xff]  }
 0x18f   :  { %v2290_v9 = vld [vmem:[%s2739_s7 + $0x38] sm:$0xff]  }
 0x190   :  { %1320 = vmatpush1.bf16.msra.mxu0 %v2205_v17  ;;  %v2294_v17 = vld [vmem:[%s2739_s7 + $0x28] sm:$0xff]  }
 0x191   :  { %1363 = vmatpush1.bf16.msra.mxu1 %v2208_v18  ;;  %1321 = vmatprep.subr.bf16.mxu0 %v2213_v19  ;;  %v2295_v18 = vld [vmem:[%s2739_s7 + $0x60] sm:$0xff]  }
 0x192   :  { %1364 = vmatprep.subr.bf16.mxu1 %v2216_v20  ;;  %v2296_v19 = vld [vmem:[%s2739_s7 + $0x20] sm:$0xff]   ;;  %v2297_v20 = vld [vmem:[%s2739_s7 + $0x58] sm:$0xff]  }
 0x194   :  { %1322 = vmatpush1.bf16.msra.mxu0 %v2211_v21  ;;  %v2298_v21 = vld [vmem:[%s2739_s7 + $0x18] sm:$0xff]  }
 0x195   :  { %1365 = vmatpush1.bf16.msra.mxu1 %v2214_v22  ;;  %1323 = vmatprep.subr.bf16.mxu0 %v2219_v23  ;;  %v2299_v22 = vld [vmem:[%s2739_s7 + $0x50] sm:$0xff]  }
 0x196   :  { %1366 = vmatprep.subr.bf16.mxu1 %v2222_v24  ;;  %v2300_v23 = vld [vmem:[%s2739_s7 + $0x10] sm:$0xff]   ;;  %v2301_v24 = vld [vmem:[%s2739_s7 + $0x48] sm:$0xff]  }
 0x198   :  { %1324 = vmatpush1.bf16.msra.mxu0 %v2217_v25  ;;  %v2302_v25 = vld [vmem:[%s2739_s7 + $0x8] sm:$0xff]  }
 0x199   :  { %1367 = vmatpush1.bf16.msra.mxu1 %v2220_v26  ;;  %1325 = vmatprep.subr.bf16.mxu0 %v2225_v27  ;;  %v2303_v26 = vld [vmem:[%s2739_s7 + $0x40] sm:$0xff]  }
 0x19a   :  { %1368 = vmatprep.subr.bf16.mxu1 %v2228_v28  ;;  %v2304_v27 = vld [vmem:[%s2739_s7] sm:$0xff]   ;;  %v2305_v28 = vld [vmem:[%s2739_s7 + $0xf8] sm:$0xff]  }
 0x19c   :  { %1326 = vmatpush1.bf16.msra.mxu0 %v2223_v29  ;;  %v2306_v29 = vld [vmem:[%s2739_s7 + $0xb8] sm:$0xff]  }
 0x19d   :  { %1369 = vmatpush1.bf16.msra.mxu1 %v2226_v30  ;;  %1327 = vmatprep.subr.bf16.mxu0 %v2231_v31  ;;  %v2307_v30 = vld [vmem:[%s2739_s7 + $0xf0] sm:$0xff]  }
 0x19e   :  { %1370 = vmatprep.subr.bf16.mxu1 %v2234_v32  ;;  %v2308_v31 = vld [vmem:[%s2739_s7 + $0xb0] sm:$0xff]   ;;  %v2309_v32 = vld [vmem:[%s2739_s7 + $0xe8] sm:$0xff]  }
 0x1a0   :  { %1328 = vmatpush1.bf16.msra.mxu0 %v2229_v33  ;;  %v2310_v33 = vld [vmem:[%s2739_s7 + $0xa8] sm:$0xff]  }
 0x1a1   :  { %1371 = vmatpush1.bf16.msra.mxu1 %v2232_v34  ;;  %1329 = vmatprep.subr.bf16.mxu0 %v2237_v35  ;;  %v2311_v34 = vld [vmem:[%s2739_s7 + $0xe0] sm:$0xff]  }
 0x1a2   :  { %1372 = vmatprep.subr.bf16.mxu1 %v2240_v36  ;;  %v2312_v35 = vld [vmem:[%s2739_s7 + $0xa0] sm:$0xff]   ;;  %v2313_v36 = vld [vmem:[%s2739_s7 + $0xd8] sm:$0xff]  }
 0x1a4   :  { %1330 = vmatpush1.bf16.msra.mxu0 %v2235_v37  ;;  %v2314_v37 = vld [vmem:[%s2739_s7 + $0x98] sm:$0xff]  }
 0x1a5   :  { %1373 = vmatpush1.bf16.msra.mxu1 %v2238_v38  ;;  %1331 = vmatprep.subr.bf16.mxu0 %v2243_v39  ;;  %v2315_v38 = vld [vmem:[%s2739_s7 + $0xd0] sm:$0xff]  }
 0x1a6   :  { %1374 = vmatprep.subr.bf16.mxu1 %v2246_v40  ;;  %v2316_v39 = vld [vmem:[%s2739_s7 + $0x90] sm:$0xff]   ;;  %v2317_v40 = vld [vmem:[%s2739_s7 + $0xc8] sm:$0xff]  }
 0x1a8   :  { %1332 = vmatpush2.bf16.msra.mxu0 %v2241_v41  ;;  %v2318_v41 = vld [vmem:[%s2739_s7 + $0x88] sm:$0xff]  }
 0x1a9   :  { %1375 = vmatpush2.bf16.msra.mxu1 %v2244_v42  ;;  %1333 = vmatprep.subr.bf16.mxu0 %v2249_v43  ;;  %v2319_v42 = vld [vmem:[%s2739_s7 + $0xc0] sm:$0xff]  }
 0x1aa   :  { %1376 = vmatprep.subr.bf16.mxu1 %v2252_v44  ;;  %v2320_v43 = vld [vmem:[%s2739_s7 + $0x80] sm:$0xff]  }
 0x1ab   :  { %v567_v44 = vld [vmem:[%s2738_s6] sm:$0xf] }
 0x1ac   :  { %1334 = vmatpush2.bf16.msra.mxu0 %v2247_v45  ;;  %v572_v45 = vrot.slane %v567_v44, %v123_v55 }
 0x1ad   :  { %1377 = vmatpush2.bf16.msra.mxu1 %v2250_v46  ;;  %1335 = vmatprep.subr.bf16.mxu0 %v2255_v47  ;;  %v576_v46 = vrot.slane %v567_v44, %v127_v58 }
 0x1ae   :  { %1378 = vmatprep.subr.bf16.mxu1 %v2258_v48 }
 0x1b0   :  { %1336 = vmatpush2.bf16.msra.mxu0 %v2253_v49 }
 0x1b1   :  { %1379 = vmatpush2.bf16.msra.mxu1 %v2256_v50  ;;  %1337 = vmatprep.subr.bf16.mxu0 %v2261_v51 }
 0x1b2   :  { %1380 = vmatprep.subr.bf16.mxu1 %v2264_v52 }
 0x1b4   :  { %1338 = vmatpush2.bf16.msra.mxu0 %v2259_v53 }
 0x1b5   :  { %1381 = vmatpush2.bf16.msra.mxu1 %v2262_v57  ;;  %1339 = vmatprep.subr.bf16.mxu0 %v2267_v60 }
 0x1b6   :  { %1382 = vmatprep.subr.bf16.mxu1 %v2270_v61 }
 0x1b8   :  { %1340 = vmatpush2.bf16.msra.mxu0 %v2265_v62 }
 0x1b9   :  { %1383 = vmatpush2.bf16.msra.mxu1 %v2268_v63  ;;  %1341 = vmatprep.subr.bf16.mxu0 %v2273_v0 }
 0x1ba   :  { %1384 = vmatprep.subr.bf16.mxu1 %v2276_v1 }
 0x1bc   :  { %1342 = vmatpush2.bf16.msra.mxu0 %v2271_v4 }
 0x1bd   :  { %1385 = vmatpush2.bf16.msra.mxu1 %v2274_v5  ;;  %1343 = vmatprep.subr.bf16.mxu0 %v2279_v6 }
 0x1be   :  { %1386 = vmatprep.subr.bf16.mxu1 %v2282_v7 }
 0x1c0   :  { %1344 = vmatpush2.bf16.msra.mxu0 %v2277_v10 }
 0x1c1   :  { %1387 = vmatpush2.bf16.msra.mxu1 %v2280_v12  ;;  %1345 = vmatprep.subr.bf16.mxu0 %v2285_v13 }
 0x1c2   :  { %1388 = vmatprep.subr.bf16.mxu1 %v2288_v15 }
 0x1c4   :  { %1346 = vmatpush2.bf16.msra.mxu0 %v2283_v8 }
 0x1c5   :  { %1389 = vmatpush2.bf16.msra.mxu1 %v2286_v2  ;;  %1999 = vmatprep.subr.bf16.mxu0 %v2289_v3 }
 0x1c6   :  { %2021 = vmatprep.subr.bf16.mxu1 %v2305_v28  ;;  %v580_v28 = vrot.slane %v567_v44, %v131_v56 }
 0x1c7   :  { %1348 = vmatmul.mubr.bf16.vlgmr.msra.gmra.mxu0 %v2608_v11  ;;  %v2292_v11 = vld [vmem:[%s2739_s7 + $0x30] sm:$0xff]  }
 0x1c8   :  { %1391 = vmatmul.mubr.bf16.vlgmr.msra.gmra.mxu1 %v2610_v14  ;;  %2000 = vmatpush3.bf16.msra.mxu0 %v2290_v9  ;;  %v2293_v14 = vld [vmem:[%s2739_s7 + $0x68] sm:$0xff]  }
 0x1c9   :  { %2001 = vmatprep.subr.bf16.mxu0 %v2291_v16  ;;  %2022 = vmatpush3.bf16.msra.mxu1 %v2306_v29  ;;  %v584_v29 = vrot.slane %v567_v44, %v135_v59 }
 0x1ca   :  { %2023 = vmatprep.subr.bf16.mxu1 %v2307_v30 }
 0x1cc   :  { %2002 = vmatpush3.bf16.msra.mxu0 %v2292_v11 }
 0x1cd   :  { %2003 = vmatprep.subr.bf16.mxu0 %v2293_v14  ;;  %2024 = vmatpush3.bf16.msra.mxu1 %v2308_v31 }
 0x1ce   :  { %2025 = vmatprep.subr.bf16.mxu1 %v2309_v32 }
 0x1d0   :  { %2004 = vmatpush3.bf16.msra.mxu0 %v2294_v17 }
 0x1d1   :  { %2005 = vmatprep.subr.bf16.mxu0 %v2295_v18  ;;  %2026 = vmatpush3.bf16.msra.mxu1 %v2310_v33 }
 0x1d2   :  { %2027 = vmatprep.subr.bf16.mxu1 %v2311_v34 }
 0x1d4   :  { %2006 = vmatpush3.bf16.msra.mxu0 %v2296_v19 }
 0x1d5   :  { %2007 = vmatprep.subr.bf16.mxu0 %v2297_v20  ;;  %2028 = vmatpush3.bf16.msra.mxu1 %v2312_v35 }
 0x1d6   :  { %2029 = vmatprep.subr.bf16.mxu1 %v2313_v36 }
 0x1d8   :  { %2008 = vmatpush3.bf16.msra.mxu0 %v2298_v21 }
 0x1d9   :  { %2009 = vmatprep.subr.bf16.mxu0 %v2299_v22  ;;  %2030 = vmatpush3.bf16.msra.mxu1 %v2314_v37 }
 0x1da   :  { %2031 = vmatprep.subr.bf16.mxu1 %v2315_v38 }
 0x1dc   :  { %2010 = vmatpush3.bf16.msra.mxu0 %v2300_v23 }
 0x1dd   :  { %2011 = vmatprep.subr.bf16.mxu0 %v2301_v24  ;;  %2032 = vmatpush3.bf16.msra.mxu1 %v2316_v39 }
 0x1de   :  { %2033 = vmatprep.subr.bf16.mxu1 %v2317_v40 }
 0x1e0   :  { %2012 = vmatpush3.bf16.msra.mxu0 %v2302_v25 }
 0x1e1   :  { %2013 = vmatprep.subr.bf16.mxu0 %v2303_v26  ;;  %2034 = vmatpush3.bf16.msra.mxu1 %v2318_v41 }
 0x1e2   :  { %2035 = vmatprep.subr.bf16.mxu1 %v2319_v42 }
 0x1e4   :  { %2014 = vmatpush3.bf16.msra.mxu0 %v2304_v27 }
 0x1e5   :  { %2036 = vmatpush3.bf16.msra.mxu1 %v2320_v43 }
 0x247   :  { %v1263_v47 = vpop.f32.mrf.mxu0 }
 0x248   :  { %v1264_v48 = vadd.f32 %v1263_v47, %v572_v45  ;;  %v1306_v49 = vpop.f32.mrf.mxu1 }
 0x249   :  { %v1265_v50 = vpop.f32.mrf.mxu0 }
 0x24a   :  { %v1307_v51 = vadd.f32 %v1306_v49, %v1264_v48  ;;  %v1266_v52 = vadd.f32 %v1265_v50, %v576_v46  ;;  %v1308_v53 = vpop.f32.mrf.mxu1 }
 0x24b   :  { %v1267_v57 = vpop.f32.mrf.mxu0 }
 0x24c   :  { %v1401_v60 = vsub.f32 0.0, %v1307_v51  ;;  %v1309_v61 = vadd.f32 %v1308_v53, %v1266_v52  ;;  %v1268_v62 = vadd.f32 %v1267_v57, %v572_v45  ;;  %v1310_v63 = vpop.f32.mrf.mxu1 }
 0x24d   :  { %v1269_v0 = vpop.f32.mrf.mxu0 }
 0x24e   :  { %v1409_v1 = vmul.f32 1.442695, %v1401_v60  ;;  %v1402_v4 = vsub.f32 0.0, %v1309_v61  ;;  %v1311_v5 = vadd.f32 %v1310_v63, %v1268_v62  ;;  %v1270_v55 = vadd.f32 %v1269_v0, %v576_v46  ;;  %v1312_v6 = vpop.f32.mrf.mxu1 }
 0x250   :  { %v1411_v7 = vmul.f32 1.442695, %v1402_v4  ;;  %v1405_v58 = vsub.f32 0.0, %v1311_v5  ;;  %v1313_v10 = vadd.f32 %v1312_v6, %v1270_v55  ;;  %2353 = vpow2.f32 %v1409_v1 }
 0x252   :  { %2355 = vpow2.f32 %v1411_v7  ;;  %v1417_v12 = vmul.f32 1.442695, %v1405_v58  ;;  %v1406_v13 = vsub.f32 0.0, %v1313_v10 }
 0x254   :  { %2357 = vpow2.f32 %v1417_v12  ;;  %v1419_v15 = vmul.f32 1.442695, %v1406_v13 }
 0x256   :  { %2359 = vpow2.f32 %v1419_v15 }
 0x25d   :  { %v2354_v8 = vpop.eup %2353 }
 0x25e   :  { %v1425_v16 = vadd.f32 1.0, %v2354_v8 }
 0x25f   :  { %v2356_v2 = vpop.eup %2355 }
 0x260   :  { %v1426_v3 = vadd.f32 1.0, %v2356_v2 }
 0x261   :  { %v2358_v9 = vpop.eup %2357 }
 0x262   :  { %v1429_v11 = vadd.f32 1.0, %v2358_v9  ;;  %2361 = vrcp.f32 %v1426_v3  ;;  %v1966_v3 = vld [vmem:[%s2740_s8] ss:$0 sm:$0xff] }
 0x263   :  { %v2360_v14 = vpop.eup %2359 }
 0x264   :  { %2363 = vrcp.f32 %v1429_v11  ;;  %v1430_v17 = vadd.f32 1.0, %v2360_v14 }
 0x265   :  { %2365 = vrcp.f32 %v1425_v16 }
 0x266   :  { %2367 = vrcp.f32 %v1430_v17 }
 0x26f   :  { %v2362_v18 = vpop.eup %2361 }
 0x270   :  { %v1442_v23 = vmul.f32 %v2362_v18, %v1309_v61 }
 0x271   :  { %v2364_v19 = vpop.eup %2363 }
 0x272   :  { %v2366_v20 = vpop.eup %2365  ;;  %v1445_v22 = vmul.f32 %v2364_v19, %v1311_v5 }
 0x273   :  { %v2368_v21 = vpop.eup %2367  ;;  %v1441_v25 = vmul.f32 %v2366_v20, %v1307_v51 }
 0x274   :  { %v1446_v24 = vmul.f32 %v2368_v21, %v1313_v10 }
 0x275   :  { %v1449_v27 = vpack.c.bf16 %v1445_v22, %v1441_v25 }
 0x276   :  { %v1450_v26 = vpack.c.bf16 %v1446_v24, %v1442_v23 }
 0x278   :  { %1748 = vmatprep.mubr.bf16.mxu0 %v1450_v26 }
 0x279   :  { %1749 = vmatmul.mubr.bf16.vlgmr.msra.gmra.mxu0 %v1449_v27 }
 0x287   :  { %v1349_v30 = vpop.f32.mrf.mxu0 }
 0x288   :  { %v1350_v31 = vadd.f32 %v1349_v30, %v580_v28  ;;  %v1392_v32 = vpop.f32.mrf.mxu1 }
 0x289   :  { %v1351_v33 = vpop.f32.mrf.mxu0 }
 0x28a   :  { %v1393_v34 = vadd.f32 %v1392_v32, %v1350_v31  ;;  %v1352_v35 = vadd.f32 %v1351_v33, %v584_v29  ;;  %v1394_v36 = vpop.f32.mrf.mxu1 }
 0x28b   :  { %v1353_v37 = vpop.f32.mrf.mxu0 }
 0x28c   :  { %v1403_v38 = vsub.f32 0.0, %v1393_v34  ;;  %v1395_v39 = vadd.f32 %v1394_v36, %v1352_v35  ;;  %v1354_v40 = vadd.f32 %v1353_v37, %v580_v28  ;;  %v1396_v41 = vpop.f32.mrf.mxu1 }
 0x28d   :  { %v1355_v42 = vpop.f32.mrf.mxu0 }
 0x28e   :  { %v1413_v43 = vmul.f32 1.442695, %v1403_v38  ;;  %v1404_v45 = vsub.f32 0.0, %v1395_v39  ;;  %v1397_v46 = vadd.f32 %v1396_v41, %v1354_v40  ;;  %v1356_v56 = vadd.f32 %v1355_v42, %v584_v29  ;;  %v1398_v47 = vpop.f32.mrf.mxu1 }
 0x290   :  { %v1415_v54 = vmul.f32 1.442695, %v1404_v45  ;;  %v1407_v59 = vsub.f32 0.0, %v1397_v46  ;;  %v1399_v44 = vadd.f32 %v1398_v47, %v1356_v56  ;;  %2369 = vpow2.f32 %v1413_v43 }
 0x292   :  { %2371 = vpow2.f32 %v1415_v54  ;;  %v1421_v48 = vmul.f32 1.442695, %v1407_v59  ;;  %v1408_v49 = vsub.f32 0.0, %v1399_v44 }
 0x294   :  { %2373 = vpow2.f32 %v1421_v48  ;;  %v1423_v50 = vmul.f32 1.442695, %v1408_v49 }
 0x296   :  { %2375 = vpow2.f32 %v1423_v50 }
 0x29d   :  { %v2370_v51 = vpop.eup %2369 }
 0x29e   :  { %v1427_v60 = vadd.f32 1.0, %v2370_v51 }
 0x29f   :  { %v2372_v52 = vpop.eup %2371 }
 0x2a0   :  { %v1428_v53 = vadd.f32 1.0, %v2372_v52 }
 0x2a1   :  { %v2374_v57 = vpop.eup %2373 }
 0x2a2   :  { %v1431_v61 = vadd.f32 1.0, %v2374_v57  ;;  %2377 = vrcp.f32 %v1428_v53 }
 0x2a3   :  { %v2376_v62 = vpop.eup %2375 }
 0x2a4   :  { %2379 = vrcp.f32 %v1431_v61  ;;  %v1432_v63 = vadd.f32 1.0, %v2376_v62 }
 0x2a5   :  { %2381 = vrcp.f32 %v1427_v60 }
 0x2a6   :  { %2383 = vrcp.f32 %v1432_v63 }
 0x2af   :  { %v2378_v0 = vpop.eup %2377 }
 0x2b0   :  { %v1444_v6 = vmul.f32 %v2378_v0, %v1395_v39 }
 0x2b1   :  { %v2380_v1 = vpop.eup %2379 }
 0x2b2   :  { %v2382_v4 = vpop.eup %2381  ;;  %v1447_v55 = vmul.f32 %v2380_v1, %v1397_v46 }
 0x2b3   :  { %v2384_v5 = vpop.eup %2383  ;;  %v1443_v58 = vmul.f32 %v2382_v4, %v1393_v34 }
 0x2b4   :  { %v1448_v7 = vmul.f32 %v2384_v5, %v1399_v44 }
 0x2b5   :  { %v1451_v12 = vpack.c.bf16 %v1447_v55, %v1443_v58 }
 0x2b6   :  { %v1452_v10 = vpack.c.bf16 %v1448_v7, %v1444_v6 }
 0x2b8   :  { %1789 = vmatprep.mubr.bf16.mxu1 %v1452_v10 }
 0x2b9   :  { %1790 = vmatmul.mubr.bf16.vlgmr.msra.gmra.mxu1 %v1451_v12 }
 0x339   :  { %v2015_v13 = vpop.f32.mrf.mxu0 }
 0x33b   :  { %v2016_v15 = vpop.f32.mrf.mxu0 }
 0x33c   :  { %v2017_v2 = vadd.f32 %v2016_v15, %v2015_v13 }
 0x33d   :  { %v2018_v8 = vpop.f32.mrf.mxu0 }
 0x33e   :  { %v1751_v14 = vadd.f32 %v2017_v2, %v1966_v3 }
 0x33f   :  { %v2019_v9 = vpop.f32.mrf.mxu0 }
 0x340   :  { %v2020_v17 = vadd.f32 %v2019_v9, %v2018_v8 }
 0x342   :  { %v1754_v22 = vadd.f32 %v2020_v17, %v1966_v3 }
 0x379   :  { %v2037_v16 = vpop.f32.mrf.mxu1 }
 0x37b   :  { %v2038_v11 = vpop.f32.mrf.mxu1 }
 0x37c   :  { %v2039_v18 = vadd.f32 %v2038_v11, %v2037_v16 }
 0x37d   :  { %v2040_v19 = vpop.f32.mrf.mxu1 }
 0x37e   :  { %v1792_v20 = vadd.f32 %v2039_v18, %v1751_v14 }
 0x37f   :  { %v2041_v21 = vpop.f32.mrf.mxu1 }
 0x380   :  { %1798 = vst [vmem:[%s2741_s9] sm:$0xff] %v1792_v20  ;;  %v2042_v23 = vadd.f32 %v2041_v21, %v2040_v19 }
 0x382   :  { %v1795_v24 = vadd.f32 %v2042_v23, %v1754_v22 }
 0x384   :  { %1799 = vst [vmem:[%s2741_s9 + $0x8] sm:$0xff] %v1795_v24 }
 0x385   :  { %1804 = vsyncpa [#allocation3], 1 }

</bundles_post_ra>
